<compile_context>
chip_gen: v7x
topology: tpu7x:2x2x1
jax: 0.10.0
libtpu: 0.0.40
codegen_flags: <defaults>
</compile_context>

<pallas_src>
import jax
import jax.numpy as jnp
from jax.experimental import pallas as pl
from jax.experimental.pallas import tpu as pltpu


def linear_bias_sub_kernel(x_ref, wt_ref, b_ref, v_ref, vsub_ref):
    """x: (tm, IN), wt: (IN, OUT) (pre-transposed), b: (1, OUT),
    v/vsub: (tm, OUT) written separately."""
    acc = jnp.dot(x_ref[...], wt_ref[...],
                  preferred_element_type=jnp.float32)          # (tm, OUT) on MXU
    b = b_ref[...]
    v = (acc + b.astype(jnp.float32)).astype(v_ref.dtype)      # v = x W^T + b
    v_ref[...] = v
    # PyTorch order: subtract bias from the already-rounded v, in the v dtype.
    vsub_ref[...] = (v - b.astype(v_ref.dtype)).astype(vsub_ref.dtype)


def linear_with_bias_sub(x, weight, bias, *, tm=512):
    """x: (B, IN), weight: (OUT, IN), bias: (OUT,) -> (v, v_sub), each (B, OUT)."""
    B, IN = x.shape
    OUT = weight.shape[0]
    dtype = x.dtype

    # One-time transpose in the wrapper (hoisted out of the grid loop).
    wt = weight.T                       # (IN, OUT)
    b2d = bias.reshape(1, OUT)

    vmem_space = pltpu.MemorySpace.VMEM

    if B <= tm:
        # Small problem: single block, no grid, everything resident in VMEM.
        v, v_sub = pl.pallas_call(
            linear_bias_sub_kernel,
            out_shape=(jax.ShapeDtypeStruct((B, OUT), dtype),
                       jax.ShapeDtypeStruct((B, OUT), dtype)),
            in_specs=[
                pl.BlockSpec(memory_space=vmem_space),
                pl.BlockSpec(memory_space=vmem_space),
                pl.BlockSpec(memory_space=vmem_space),
            ],
            out_specs=(
                pl.BlockSpec(memory_space=vmem_space),
                pl.BlockSpec(memory_space=vmem_space),
            ),
        )(x, wt, b2d)
        return v, v_sub

    # ---- Tiled path: tile only over B; weight/bias stay VMEM-resident. ----
    itemsize = jnp.dtype(dtype).itemsize

    def tile_bytes(t):
        # x tile double-buffered, weight/bias single-buffered (Buffered(1)),
        # two output tiles double-buffered each.
        return (2 * t * IN + IN * OUT + OUT + 2 * 2 * t * OUT) * itemsize

    budget = 36 * 1024 * 1024           # conservative, v7x-safe tile budget
    while tm > 128 and tile_bytes(tm) > budget:
        tm //= 2

    n_tiles = pl.cdiv(B, tm)
    Bp = n_tiles * tm
    xp = x if Bp == B else jnp.pad(x, ((0, Bp - B), (0, 0)))

    vmem_limit = max(32 * 1024 * 1024,
                     min(48 * 1024 * 1024,
                         int(tile_bytes(tm) * 1.25) + (2 << 20)))

    v, v_sub = pl.pallas_call(
        linear_bias_sub_kernel,
        out_shape=(jax.ShapeDtypeStruct((Bp, OUT), dtype),
                   jax.ShapeDtypeStruct((Bp, OUT), dtype)),
        grid=(n_tiles,),
        in_specs=[
            pl.BlockSpec((tm, IN), lambda i: (i, 0)),            # x tile
            pl.BlockSpec((IN, OUT), lambda i: (0, 0),            # resident weight
                         pipeline_mode=pl.Buffered(1)),
            pl.BlockSpec((1, OUT), lambda i: (0, 0),             # resident bias
                         pipeline_mode=pl.Buffered(1)),
        ],
        out_specs=(
            pl.BlockSpec((tm, OUT), lambda i: (i, 0)),
            pl.BlockSpec((tm, OUT), lambda i: (i, 0)),
        ),
        compiler_params=pltpu.CompilerParams(
            dimension_semantics=("parallel",),                   # megacore on v7x
            vmem_limit_bytes=vmem_limit,
        ),
    )(xp, wt, b2d)

    if Bp != B:
        v, v_sub = v[:B], v_sub[:B]
    return v, v_sub


if __name__ == "__main__":
    # Small shapes consistent with the module's intent (linear over the
    # 32-wide feature dim of x = randn(., 32)).
    B, IN, OUT = 4, 32, 16

    key = jax.random.PRNGKey(0)
    kx, kw, kb, kx2 = jax.random.split(key, 4)

    x = jax.random.normal(kx, (B, IN), dtype=jnp.float32)
    weight = jax.random.normal(kw, (OUT, IN), dtype=jnp.float32) * (1.0 / jnp.sqrt(IN))
    bias = jax.random.uniform(kb, (OUT,), dtype=jnp.float32)

    # --- small (no-grid) path, like the module's (1, 32) input ---
    v, v_sub = linear_with_bias_sub(x, weight, bias)
    jax.block_until_ready((v, v_sub))

    v_ref = x @ weight.T + bias
    assert jnp.allclose(v, v_ref, atol=1e-5), "v mismatch (small path)"
    assert jnp.allclose(v_sub, v_ref - bias, atol=1e-5), "v_sub mismatch (small path)"

    # --- tiled (grid) path, ragged batch to exercise cdiv + padding ---
    B2 = 300
    x2 = jax.random.normal(kx2, (B2, IN), dtype=jnp.float32)
    v2, v2_sub = linear_with_bias_sub(x2, weight, bias, tm=128)
    jax.block_until_ready((v2, v2_sub))

    v2_ref = x2 @ weight.T + bias
    assert jnp.allclose(v2, v2_ref, atol=1e-5), "v mismatch (tiled path)"
    assert jnp.allclose(v2_sub, v2_ref - bias, atol=1e-5), "v_sub mismatch (tiled path)"

    print("KERNEL_OK")
</pallas_src>

<mosaic_0001>
module attributes {stable_mosaic.version = 11 : i64} {
  func.func @linear_bias_sub_kernel(%arg0: memref<4x32xf32, #tpu.memory_space<vmem>>, %arg1: memref<32x16xf32, #tpu.memory_space<vmem>>, %arg2: memref<1x16xf32, #tpu.memory_space<vmem>>, %arg3: memref<4x16xf32, #tpu.memory_space<vmem>>, %arg4: memref<4x16xf32, #tpu.memory_space<vmem>>) attributes {dimension_semantics = [], scalar_prefetch = 0 : i64, scratch_operands = 0 : i64, tpu.core_type = #tpu.core_type<tc>} {
    %c0 = arith.constant 0 : index
    %c0_0 = arith.constant 0 : index
    %0 = vector.load %arg0[%c0, %c0_0] : memref<4x32xf32, #tpu.memory_space<vmem>>, vector<4x32xf32>
    %c0_1 = arith.constant 0 : index
    %c0_2 = arith.constant 0 : index
    %1 = vector.load %arg1[%c0_1, %c0_2] : memref<32x16xf32, #tpu.memory_space<vmem>>, vector<32x16xf32>
    %cst = arith.constant dense<0.000000e+00> : vector<4x16xf32>
    %2 = tpu.matmul %0, %1, %cst {dimension_numbers = #tpu.dot_dimension_numbers<[1], [0], [0], [1], [0, 0, 1, 1], [], []>} : vector<4x32xf32>, vector<32x16xf32>, vector<4x16xf32> -> vector<4x16xf32>
    %c0_3 = arith.constant 0 : index
    %c0_4 = arith.constant 0 : index
    %3 = vector.load %arg2[%c0_3, %c0_4] : memref<1x16xf32, #tpu.memory_space<vmem>>, vector<1x16xf32>
    %4 = vector.broadcast %3 : vector<1x16xf32> to vector<4x16xf32>
    %5 = arith.addf %2, %4 : vector<4x16xf32>
    %c0_5 = arith.constant 0 : index
    %c0_6 = arith.constant 0 : index
    %6 = vector.load %arg3[%c0_5, %c0_6] : memref<4x16xf32, #tpu.memory_space<vmem>>, vector<4x16xf32>
    tpu.vector_store %arg3[%c0_5, %c0_6], %5 {strides = array<i32>} : memref<4x16xf32, #tpu.memory_space<vmem>>, vector<4x16xf32>,
    %7 = vector.broadcast %3 : vector<1x16xf32> to vector<4x16xf32>
    %8 = arith.subf %5, %7 : vector<4x16xf32>
    %c0_7 = arith.constant 0 : index
    %c0_8 = arith.constant 0 : index
    %9 = vector.load %arg4[%c0_7, %c0_8] : memref<4x16xf32, #tpu.memory_space<vmem>>, vector<4x16xf32>
    tpu.vector_store %arg4[%c0_7, %c0_8], %8 {strides = array<i32>} : memref<4x16xf32, #tpu.memory_space<vmem>>, vector<4x16xf32>,
    return
  }
}

</mosaic_0001>

<bundles_post_ra>
// kernel: tpu_custom_call.1
= control target key start
LH: loop header
LB: loop body
LE: loop exit
PB: predicated region body
PF: predicated region fallthrough
CT: control target
= control target key end

     0   :  { %10 = vsyncpa [#allocation3], 0  ;;  %v213_v3 = vmov 0.0|0.0   ;;  %vm214_vm0 = vmmov 0   ;;  %v215_v6 = vmov 0.0   ;;  %s287_s0 = inlined_call_operand.vmem [shape: f32[4,32], index: 0, kind: input, shape index: {}]   ;;  %s288_s1 = inlined_call_operand.vmem [shape: f32[32,16], index: 1, kind: input, shape index: {}]   ;;  %s289_s2 = inlined_call_operand.vmem [shape: f32[1,16], index: 2, kind: input, shape index: {}]   ;;  %s290_s3 = inlined_call_operand.hbm [shape: f32[4,16], index: 3, kind: output, shape index: {0}]   ;;  %s291_s4 = inlined_call_operand.hbm [shape: f32[4,16], index: 4, kind: output, shape index: {1}]  }
   0x1   :  { %v19_v0 = vld [vmem:[%s288_s1] sm:$0xff]  ;;  %v20_v1 = vld [vmem:[%s288_s1 + $0x8] sm:$0xff]  ;;  %v21_v2 = vld [vmem:[%s288_s1 + $0x10] sm:$0xff]  ;;  %154 = vmatprep.subr.bf16.mxu0 %v213_v3  ;;  %151 = vmatprep.mubr.msk.f32.mxu0 %vm214_vm0, %v215_v6 }
   0x2   :  { %v155_v4 = vpack.c.bf16 %v20_v1, %v19_v0  ;;  %v22_v5 = vld [vmem:[%s288_s1 + $0x18] sm:$0xff] }
   0x3   :  { %11 = vsyncpa [#allocation5], 0  ;;  %v158_v7 = vpack.c.bf16 %v22_v5, %v21_v2  ;;  %v18_v8 = vld [vmem:[%s287_s0] sm:$0xf]  ;;  %vm30_vm1 = vcmask 261120   ;;  %s216_s27 = smov [#allocation2]  }
   0x4   :  { %156 = vmatpush3.bf16.msra.mxu0 %v155_v4  ;;  %v136_v9 = vld [vmem:[%s289_s2] ss:$0 sm:$0xff]  ;;  %s114_s1 = sshll.u32 %s216_s27, 4  ;;  %vm104_vm2 = vcmask 125952   ;;  %s217_s28 = smov [#allocation4]   ;;  %s115_s1 = int_to_ptr.vmem [resolvable:$true] %s114_s1 }
   0x5   :  { %157 = vmatprep.subr.bf16.mxu0 %v213_v3  ;;  %s124_s29 = sshll.u32 %s217_s28, 4  ;;  %s165_s0 = scalar_lea.vmem %s115_s1, 64  ;;  %s125_s29 = int_to_ptr.vmem [resolvable:$true] %s124_s29 }
   0x6   :  { %p166_p0 = scmp.ne.s32.totalorder %s115_s1, %s165_s0  ;;  %p170_p1 = scmp.lt.s32.totalorder %s115_s1, %s115_s1 }
   0x7   :  { %p171_p2 = scmp.lt.s32.totalorder %s165_s0, %s165_s0 }
   0x8   :  { %159 = vmatpush3.bf16.msra.mxu0 %v158_v7 }
   0x9   :  { %p172_p3 = por %p171_p2, %p170_p1 }
   0xb   :  { %152 = vmatmul.mubr.msk.f32.vlgmr.msra.gmra.mrb[0].mxu0 %vm30_vm1, %v18_v8  ;;  %p173_p4 = pnand %p172_p3, %p166_p0 }
  0xde   :  { %v100_v10 = vpop.f32.mrb[0].mxu0 }
  0xdf   :  { %v101_v11 = vadd.f32 %v136_v9, %v100_v10  ;;  %v153_v12 = vpop.f32.mrb[1].mxu0 }
  0xe1   :  { %v106_v13 = vsub.f32 %v101_v11, %v136_v9  ;;  %105 = vst.msk [vmem:[#allocation2] sm:$0xf] %vm104_vm2, %v101_v11 }
  0xe2   :  { %176 = shalt.err (!%p173_p4)
}
  0xe3   :  { %s177_s5 = scalar_lea.hbm %s290_s3, 64 }
  0xe4   :  { %p178_p5 = scmp.ne.s32.totalorder %s290_s3, %s177_s5  ;;  %p181_p6 = scmp.lt.u32.totalorder %s177_s5, %s290_s3 }
  0xe6   :  { %p183_p7 = pnand %p181_p6, %p178_p5 }
  0xe8   :  { %186 = shalt.err (!%p183_p7)
}
  0xe9   :  { %117 = dma.vmem_to_hbm [thread:$0]  %s115_s1, 64, %s290_s3, [#allocation3]   ;;  %107 = vst.msk [vmem:[#allocation4] sm:$0xf] %vm104_vm2, %v106_v13 }
  0xea   :  { %s187_s12 = scalar_lea.vmem %s125_s29, 64  ;;  %p192_p9 = scmp.lt.s32.totalorder %s125_s29, %s125_s29 }
  0xeb   :  { %p188_p8 = scmp.ne.s32.totalorder %s125_s29, %s187_s12  ;;  %p193_p10 = scmp.lt.s32.totalorder %s187_s12, %s187_s12 }
  0xed   :  { %p194_p11 = por %p193_p10, %p192_p9 }
  0xef   :  { %p195_p12 = pnand %p194_p11, %p188_p8 }
  0xf1   :  { %198 = shalt.err (!%p195_p12)
}
  0xf2   :  { %s199_s15 = scalar_lea.hbm %s291_s4, 64 }
  0xf3   :  { %p200_p13 = scmp.ne.s32.totalorder %s291_s4, %s199_s15  ;;  %p203_p0 = scmp.lt.u32.totalorder %s199_s15, %s291_s4 }
  0xf5   :  { %p205_p1 = pnand %p203_p0, %p200_p13 }
  0xf7   :  { %208 = shalt.err (!%p205_p1)
}
  0xf8   :  { %127 = dma.vmem_to_hbm [thread:$0]  %s125_s29, 64, %s291_s4, [#allocation5]  }
  0xf9   :  { %209 = dma.done.wait [#allocation3], 64  }
  0xfa   :  { %210 = vsyncadd [#allocation3], 4294967232 }
  0xfb   :  { %211 = dma.done.wait [#allocation5], 64  }
  0xfc   :  { %212 = vsyncadd [#allocation5], 4294967232 }
  0xfd   :  { %134 = vsyncpa [#allocation3], 1 }
  0xfe   :  { %135 = vsyncpa [#allocation5], 1 }

</bundles_post_ra>
